<compile_context>
chip_gen: v6e
topology: v6e:2x2x1
jax: 0.10.0
libtpu: 0.0.40
codegen_flags: <defaults>
</compile_context>

<pallas_src>
import numpy as np
import jax
import jax.numpy as jnp
from jax.experimental import pallas as pl
from jax.experimental.pallas import tpu as pltpu


def _round_up(x: int, m: int) -> int:
    return (x + m - 1) // m * m


# ----------------------------- Pallas kernels -----------------------------

def proj_kernel(x_ref, w_ref, o_ref):
    # x: (TM, D) bf16, w: (D, DOUT) bf16  ->  o: (TM, DOUT) bf16 (f32 accumulate)
    o_ref[...] = jnp.dot(x_ref[...], w_ref[...],
                         preferred_element_type=jnp.float32).astype(o_ref.dtype)


def gat_attention_kernel(slab_off_ref,                 # SMEM (n_blocks,) int32
                         starts_ref, counts_ref, e_ref, whjs_hbm,   # inputs
                         o_ref,                        # output (TN, DOUT) f32
                         slab_buf, sem):               # scratch
    # starts_ref : VMEM (TN, 1) int32   per-node start row inside this block's slab
    # counts_ref : VMEM (TN, 1) int32   per-node neighbor count (0 for padded nodes)
    # e_ref      : VMEM (1, 8, SLAB) f32  per-row pre-activation logits, lane oriented
    # whjs_hbm   : HBM  (M_pad, DOUT) bf16  projected neighbors (stays in HBM)
    # slab_buf   : VMEM (2, SLAB, DOUT) bf16  double-buffered neighbor slab
    i = pl.program_id(0)
    n_blk = pl.num_programs(0)
    slot = i % 2
    _, slab_rows, _ = slab_buf.shape
    tn = o_ref.shape[0]

    def issue(blk, to_slot):
        off = slab_off_ref[blk]
        pltpu.make_async_copy(whjs_hbm.at[pl.ds(off, slab_rows)],
                              slab_buf.at[to_slot], sem.at[to_slot]).start()

    # Prime the pipeline with this block's slab, then prefetch the next block's
    # slab into the other buffer so the HBM gather is hidden behind compute.
    @pl.when(i == 0)
    def _():
        issue(0, 0)

    @pl.when(i + 1 < n_blk)
    def _():
        issue(i + 1, 1 - slot)

    # ---- masked segment softmax (does not need the slab -> overlaps the DMA)
    e_pre = e_ref[...][0, 0:1, :]                                   # (1, SLAB) f32
    e_act = jnp.where(e_pre > 0, e_pre, jnp.float32(0.01) * e_pre)  # leaky_relu
    starts = starts_ref[...]                                        # (TN, 1) int32
    counts = counts_ref[...]                                        # (TN, 1) int32
    r = jax.lax.broadcasted_iota(jnp.int32, (tn, slab_rows), 1)
    valid = (r >= starts) & (r < starts + counts)                   # segment membership
    e = jnp.where(valid, e_act, jnp.float32(-1e30))                 # (TN, SLAB)
    m = jnp.max(e, axis=1, keepdims=True)
    p = jnp.where(valid, jnp.exp(e - m), jnp.float32(0.0))
    denom = jnp.maximum(jnp.sum(p, axis=1, keepdims=True), jnp.float32(1e-30))
    alpha = p * pl.reciprocal(denom, approx=True)                   # EUP, not a divide
    alpha = jnp.where(counts > 0, alpha, jnp.float32(0.0))          # no NaN on padded rows

    # ---- wait for this block's slab, weighted sum on the MXU, final ReLU
    pltpu.make_async_copy(whjs_hbm.at[pl.ds(slab_off_ref[i], slab_rows)],
                          slab_buf.at[slot], sem.at[slot]).wait()
    out = jnp.dot(alpha.astype(jnp.bfloat16), slab_buf[slot],
                  preferred_element_type=jnp.float32)               # (TN, DOUT)
    o_ref[...] = jnp.maximum(out, jnp.float32(0.0))


# ------------------------------ JAX wrappers -------------------------------

def pallas_project(x_bf16, w_bf16, tm):
    rows, d_in = x_bf16.shape
    d_out = w_bf16.shape[1]
    return pl.pallas_call(
        proj_kernel,
        out_shape=jax.ShapeDtypeStruct((rows, d_out), jnp.bfloat16),
        grid_spec=pltpu.PrefetchScalarGridSpec(
            num_scalar_prefetch=0,
            grid=(rows // tm,),
            in_specs=[pl.BlockSpec((tm, d_in), lambda i: (i, 0)),
                      pl.BlockSpec((d_in, d_out), lambda i: (0, 0))],
            out_specs=pl.BlockSpec((tm, d_out), lambda i: (i, 0)),
        ),
        compiler_params=pltpu.CompilerParams(
            dimension_semantics=("parallel",),
            vmem_limit_bytes=32 * 1024 * 1024),
        cost_estimate=pl.CostEstimate(
            flops=2 * rows * d_in * d_out,
            transcendentals=0,
            bytes_accessed=rows * d_in * 2 + d_in * d_out * 2 + rows * d_out * 2),
    )(x_bf16, w_bf16)


def pallas_gat_attention(slab_offs, starts, counts, e_blocks, whjs, *, tn, slab):
    n_pad = starts.shape[0]
    dout = whjs.shape[1]
    n_blocks = n_pad // tn
    return pl.pallas_call(
        gat_attention_kernel,
        out_shape=jax.ShapeDtypeStruct((n_pad, dout), jnp.float32),
        grid_spec=pltpu.PrefetchScalarGridSpec(
            num_scalar_prefetch=1,                       # slab_offs -> SMEM
            grid=(n_blocks,),
            in_specs=[pl.BlockSpec((tn, 1), lambda i, so: (i, 0)),
                      pl.BlockSpec((tn, 1), lambda i, so: (i, 0)),
                      pl.BlockSpec((1, 8, slab), lambda i, so: (i, 0, 0)),
                      pl.BlockSpec(memory_space=pl.ANY)],   # whjs stays in HBM
            out_specs=pl.BlockSpec((tn, dout), lambda i, so: (i, 0)),
            scratch_shapes=[pltpu.VMEM((2, slab, dout), jnp.bfloat16),
                            pltpu.SemaphoreType.DMA((2,))],
        ),
        # "arbitrary": the cross-step slab prefetch (block i issues block i+1's
        # DMA) requires the grid to run sequentially on one core.
        compiler_params=pltpu.CompilerParams(
            dimension_semantics=("arbitrary",),
            vmem_limit_bytes=32 * 1024 * 1024),
        cost_estimate=pl.CostEstimate(
            flops=2 * n_pad * slab * dout,
            transcendentals=n_pad * slab,
            bytes_accessed=n_blocks * slab * dout * 2 + n_pad * dout * 4),
    )(slab_offs, starts, counts, e_blocks, whjs)


def gat_forward(h, hjs, n_list, W, key_w, *, tn=64, tm=512):
    """Pallas implementation of GAT.forward.  n_list: static Python list."""
    N, D = h.shape
    M = hjs.shape[0]
    n_arr = np.asarray(n_list, dtype=np.int64)
    assert M == int(n_arr.sum())

    dout = _round_up(D, 128)                       # lane-dense projection width
    tn = max(8, _round_up(min(tn, _round_up(N, 8)), 8))
    n_pad = _round_up(N, tn)
    n_blocks = n_pad // tn

    # ---- static segment metadata (n_list is static host metadata) ----------
    offs = np.concatenate([[0], np.cumsum(n_arr)[:-1]]).astype(np.int64)   # (N,)
    ends = offs + n_arr
    blk_start = np.zeros(n_blocks, np.int64)
    blk_end = np.zeros(n_blocks, np.int64)
    for b in range(n_blocks):
        lo, hi = b * tn, min(b * tn + tn, N)
        if lo < N:
            blk_start[b] = offs[lo]
            blk_end[b] = ends[hi - 1]
    aligned = (blk_start // 8) * 8                 # sublane-aligned slab starts
    slab = int(_round_up(max(int((blk_end - aligned).max()), 8), 8))
    max_end = int((aligned + slab).max())          # rows kernel 2 may DMA

    # ---- projection of hjs (the only heavy matmul), bf16 in/out ------------
    m_rows = _round_up(max_end, 8)
    if m_rows <= tm:
        tm = m_rows
    else:
        m_rows = _round_up(m_rows, tm)
    hjs_pad = jnp.zeros((m_rows, D), jnp.bfloat16).at[:M].set(hjs.astype(jnp.bfloat16))
    wt = jnp.asarray(W, jnp.float32).T                               # (D, D)
    w_pad = jnp.zeros((D, dout), jnp.bfloat16).at[:, :D].set(wt.astype(jnp.bfloat16))
    whjs = pallas_project(hjs_pad, w_pad, tm)      # (m_rows, dout) bf16, stays in HBM

    # ---- tiny f32 matvecs for the attention logits (done in XLA) -----------
    key_f = jnp.asarray(key_w, jnp.float32)
    a_i = wt @ key_f[:D]                           # W^T key_i
    a_j = wt @ key_f[D:]                           # W^T key_j
    si = jnp.asarray(h, jnp.float32) @ a_i         # (N,)   s_i per node
    sj = jnp.asarray(hjs, jnp.float32) @ a_j       # (M,)   s_j per neighbor row
    owner = np.repeat(np.arange(N), n_arr)         # static row -> owner node map
    e_rows = jnp.take(si, jnp.asarray(owner, np.int32)) + sj          # (M,)
    e_pad = jnp.zeros((m_rows,), jnp.float32).at[:M].set(e_rows)
    # per-block, lane-oriented logit windows (static gather indices)
    gather_idx = (aligned[:, None] + np.arange(slab)[None, :]).astype(np.int32)
    e_win = jnp.take(e_pad, jnp.asarray(gather_idx))                  # (n_blocks, slab)
    e_blocks = jnp.broadcast_to(e_win[:, None, :], (n_blocks, 8, slab))

    # per-node slab-local start offsets and counts
    starts_local = np.zeros((n_pad, 1), np.int32)
    counts = np.zeros((n_pad, 1), np.int32)
    for idx in range(N):
        b = idx // tn
        starts_local[idx, 0] = int(offs[idx] - aligned[b])
        counts[idx, 0] = int(n_arr[idx])
    slab_offs = aligned.astype(np.int32)           # (n_blocks,) DMA row offsets

    out = pallas_gat_attention(jnp.asarray(slab_offs), jnp.asarray(starts_local),
                               jnp.asarray(counts), e_blocks, whjs,
                               tn=tn, slab=slab)
    return out[:N, :D]


# ------------------------------- reference ---------------------------------

def gat_reference(h, hjs, n_list, W, key_w):
    wh = h @ W.T
    whjs = hjs @ W.T
    offs = np.concatenate([[0], np.cumsum(n_list)]).astype(np.int64)
    outs = []
    for i, ni in enumerate(n_list):
        ni = int(ni)
        seg = whjs[int(offs[i]):int(offs[i]) + ni]                   # (ni, D)
        qk = jnp.concatenate([jnp.tile(wh[i][None, :], (ni, 1)), seg], axis=1)
        e = qk @ key_w.reshape(-1, 1)                                # (ni, 1)
        e = jnp.where(e > 0, e, 0.01 * e)
        a = jax.nn.softmax(e, axis=0)
        outs.append(jnp.sum(a * seg, axis=0))
    return jnp.maximum(jnp.stack(outs, axis=0), 0.0)


# --------------------------------- main -------------------------------------

if __name__ == "__main__":
    D = 32                                                # input_dim
    # static neighbor counts per node (24 nodes, M = 94 neighbor rows)
    n_list = [3, 5, 2, 7, 4, 1, 6, 4,
              2, 3, 8, 5, 1, 4, 6, 2,
              7, 3, 2, 5, 4, 6, 1, 3]
    N = len(n_list)
    M = int(sum(n_list))

    key = jax.random.PRNGKey(0)
    k1, k2, k3, k4 = jax.random.split(key, 4)
    W = 0.2 * jax.random.normal(k1, (D, D), dtype=jnp.float32)        # fciandj
    key_w = 0.2 * jax.random.normal(k2, (2 * D,), dtype=jnp.float32)  # key

    h = jax.random.normal(k3, (N, D), dtype=jnp.float32)
    hjs = jax.random.normal(k4, (M, D), dtype=jnp.float32)

    # small tn so the attention grid has several blocks (exercises the
    # double-buffered slab pipeline); use tn=64..128 for large graphs.
    out = jax.block_until_ready(gat_forward(h, hjs, n_list, W, key_w, tn=8))

    ref = gat_reference(h, hjs, n_list, W, key_w)
    np.testing.assert_allclose(np.asarray(out), np.asarray(ref),
                               rtol=5e-2, atol=5e-2)
    assert out.shape == (N, D)
    print("KERNEL_OK")
</pallas_src>

<mosaic_0001>
module attributes {stable_mosaic.version = 11 : i64} {
  func.func @proj_kernel(%arg0: i32, %arg1: memref<96x32xbf16, #tpu.memory_space<vmem>>, %arg2: memref<32x128xbf16, #tpu.memory_space<vmem>>, %arg3: memref<96x128xbf16, #tpu.memory_space<vmem>>) attributes {dimension_semantics = [#tpu.dimension_semantics<parallel>], iteration_bounds = array<i64: 1>, scalar_prefetch = 0 : i64, scratch_operands = 0 : i64, tpu.core_type = #tpu.core_type<tc>, window_params = [{transform_indices = @transform_0, window_bounds = array<i64: 96, 32>}, {pipeline_mode = #tpu.pipeline_mode<synchronous>, transform_indices = @transform_1, window_bounds = array<i64: 32, 128>}, {transform_indices = @transform_2, window_bounds = array<i64: 96, 128>}]} {
    %c0 = arith.constant 0 : index
    %c0_0 = arith.constant 0 : index
    %0 = vector.load %arg1[%c0, %c0_0] : memref<96x32xbf16, #tpu.memory_space<vmem>>, vector<96x32xbf16>
    %c0_1 = arith.constant 0 : index
    %c0_2 = arith.constant 0 : index
    %1 = vector.load %arg2[%c0_1, %c0_2] : memref<32x128xbf16, #tpu.memory_space<vmem>>, vector<32x128xbf16>
    %cst = arith.constant dense<0.000000e+00> : vector<96x128xf32>
    %2 = tpu.matmul %0, %1, %cst {dimension_numbers = #tpu.dot_dimension_numbers<[1], [0], [0], [1], [0, 0, 1, 1], [], []>} : vector<96x32xbf16>, vector<32x128xbf16>, vector<96x128xf32> -> vector<96x128xf32>
    %3 = arith.truncf %2 : vector<96x128xf32> to vector<96x128xbf16>
    %c0_3 = arith.constant 0 : index
    %c0_4 = arith.constant 0 : index
    %4 = vector.load %arg3[%c0_3, %c0_4] : memref<96x128xbf16, #tpu.memory_space<vmem>>, vector<96x128xbf16>
    tpu.vector_store %arg3[%c0_3, %c0_4], %3 {strides = array<i32>} : memref<96x128xbf16, #tpu.memory_space<vmem>>, vector<96x128xbf16>,
    return
  }
  func.func @transform_0(%arg0: i32) -> (i32, i32) {
    %c0_i32 = arith.constant 0 : i32
    %c0_i32_0 = arith.constant 0 : i32
    return %arg0, %c0_i32 : i32, i32
  }
  func.func @transform_1(%arg0: i32) -> (i32, i32) {
    %c0_i32 = arith.constant 0 : i32
    %c0_i32_0 = arith.constant 0 : i32
    %c0_i32_1 = arith.constant 0 : i32
    return %c0_i32, %c0_i32_0 : i32, i32
  }
  func.func @transform_2(%arg0: i32) -> (i32, i32) {
    %c0_i32 = arith.constant 0 : i32
    %c0_i32_0 = arith.constant 0 : i32
    return %arg0, %c0_i32 : i32, i32
  }
}

</mosaic_0001>

<bundles_post_ra>
// kernel: tpu_custom_call.1
= control target key start
LH: loop header
LB: loop body
LE: loop exit
PB: predicated region body
PF: predicated region fallthrough
CT: control target
= control target key end

     0   :  { %vm71_vm0 = vcmask 261120   ;;  %s432_s0 = inlined_call_operand.vmem [shape: bf16[96,32], index: 0, kind: input, shape index: {}]   ;;  %s433_s1 = inlined_call_operand.vmem [shape: bf16[32,128], index: 1, kind: input, shape index: {}]   ;;  %s434_s2 = inlined_call_operand.hbm [shape: bf16[96,128], index: 2, kind: output, shape index: {}]  }
   0x1   :  { %v351_v0 = vld [vmem:[%s433_s1 + $0x8] sm:$0xff]   ;;  %v352_v1 = vld [vmem:[%s433_s1] sm:$0xff]   ;;  %v353_v2 = vld [vmem:[%s432_s0 + $0x10] sm:$0xff]  }
   0x2   :  { %344 = vmatprep.subr.bf16.mxu1 %v351_v0  ;;  %328 = vmatprep.subr.bf16.mxu0 %v351_v0  ;;  %v355_v3 = vld [vmem:[%s432_s0] sm:$0xff]   ;;  %v354_v4 = vld [vmem:[%s432_s0 + $0x18] sm:$0xff]   ;;  %v356_v5 = vld [vmem:[%s432_s0 + $0x8] sm:$0xff]  }
   0x3   :  { %346 = vmatpush3.bf16.msra.mxu1 %v351_v0  ;;  %329 = vmatpush3.bf16.msra.mxu0 %v351_v0  ;;  %v357_v6 = vld [vmem:[%s432_s0 + $0x20] sm:$0xff]  }
   0x4   :  { %345 = vmatprep.subr.bf16.mxu1 %v352_v1  ;;  %330 = vmatprep.subr.bf16.mxu0 %v352_v1 }
   0x5   :  { %336 = vmatprep.mubr.msk.bf16.mxu1 %vm71_vm0, %v353_v2  ;;  %332 = vmatprep.mubr.msk.bf16.mxu0 %vm71_vm0, %v355_v3 }
   0x7   :  { %347 = vmatpush3.bf16.msra.mxu1 %v352_v1  ;;  %331 = vmatpush3.bf16.msra.mxu0 %v352_v1 }
   0x8   :  { %7 = vsyncpa [#allocation3], 0  ;;  %v358_v7 = vld [vmem:[%s432_s0 + $0x28] sm:$0xff]   ;;  %s381_s0 = smov [#allocation2]  }
   0x9   :  { %s236_s24 = sshll.u32 %s381_s0, 4  ;;  %s237_s24 = int_to_ptr.vmem [resolvable:$true] %s236_s24 }
   0xa   :  { %337 = vmatmul.mubr.msk.bf16.vlgmr.msra.gmra.mxu1 %vm71_vm0, %v354_v4  ;;  %333 = vmatmul.mubr.msk.bf16.vlgmr.msra.gmra.mxu0 %vm71_vm0, %v356_v5  ;;  %s359_s25 = scalar_lea.vmem %s237_s24, 768  ;;  %p364_p1 = scmp.lt.s32.totalorder %s237_s24, %s237_s24 }
   0xb   :  { %340 = vmatprep.mubr.msk.bf16.mxu1 %vm71_vm0, %v357_v6  ;;  %p360_p0 = scmp.ne.s32.totalorder %s237_s24, %s359_s25  ;;  %p365_p2 = scmp.lt.s32.totalorder %s359_s25, %s359_s25 }
   0xd   :  { %p366_p3 = por %p365_p2, %p364_p1 }
   0xf   :  { %p367_p4 = pnand %p366_p3, %p360_p0 }
  0x12   :  { %341 = vmatmul.mubr.msk.bf16.gmra.mxu1 %vm71_vm0, %v358_v7 }
  0xca   :  { %v338_v8 = vpop.f32.mrf.mxu1  ;;  %v334_v9 = vpop.f32.mrf.mxu0 }
  0xcc   :  { %v140_v10 = vpop.f32.mrf.mxu1  ;;  %v124_v11 = vpop.f32.mrf.mxu0 }
  0xce   :  { %v339_v12 = vpop.f32.mrf.mxu1  ;;  %v335_v13 = vpop.f32.mrf.mxu0 }
  0xcf   :  { %v303_v14 = vpack.c.bf16 %v339_v12, %v338_v8  ;;  %v293_v15 = vpack.c.bf16 %v335_v13, %v334_v9 }
  0xd0   :  { %v143_v16 = vpop.f32.mrf.mxu1  ;;  %v127_v17 = vpop.f32.mrf.mxu0 }
  0xd1   :  { %317 = vst [vmem:[#allocation2 + $0x18] sm:$0xff] %v303_v14   ;;  %315 = vst [vmem:[#allocation2 + $0x8] sm:$0xff] %v293_v15   ;;  %v298_v18 = vpack.c.bf16 %v143_v16, %v140_v10  ;;  %v288_v19 = vpack.c.bf16 %v127_v17, %v124_v11 }
  0xd2   :  { %v342_v20 = vpop.f32.mrf.mxu1 }
  0xd3   :  { %316 = vst [vmem:[#allocation2 + $0x10] sm:$0xff] %v298_v18   ;;  %289 = vst [vmem:[#allocation2] sm:$0xff] %v288_v19  }
  0xd4   :  { %v156_v21 = vpop.f32.mrf.mxu1 }
  0xd6   :  { %v343_v22 = vpop.f32.mrf.mxu1 }
  0xd7   :  { %v313_v23 = vpack.c.bf16 %v343_v22, %v342_v20 }
  0xd8   :  { %v159_v24 = vpop.f32.mrf.mxu1 }
  0xd9   :  { %319 = vst [vmem:[#allocation2 + $0x28] sm:$0xff] %v313_v23   ;;  %v308_v25 = vpack.c.bf16 %v159_v24, %v156_v21 }
  0xdb   :  { %318 = vst [vmem:[#allocation2 + $0x20] sm:$0xff] %v308_v25  }
  0xdc   :  { %370 = shalt.err (!%p367_p4)
}
  0xdd   :  { %s382_s26 = smov 64   ;;  %s383_s27 = smov 4  }
  0xde   :  { %242 = dma.vmem_to_hbm [thread:$0]  %s237_s24, 768, %s434_s2, [#allocation3], %s382_s26, %s382_s26, %s383_s27  }
  0xdf   :  { %379 = dma.done.wait [#allocation3], 768  }
  0xe0   :  { %380 = vsyncadd [#allocation3], 4294966528 }
  0xe1   :  { %246 = vsyncpa [#allocation3], 1 }

</bundles_post_ra>
